<compile_context>
chip_gen: v5e
topology: v5e:2x2
jax: 0.10.0
libtpu: 0.0.40
codegen_flags: <defaults>
</compile_context>

<pallas_src>
import functools

import jax
import jax.numpy as jnp
from jax import lax
from jax.experimental import pallas as pl
from jax.experimental.pallas import tpu as pltpu


def _round_up(v, m):
    return ((v + m - 1) // m) * m


def _tpu_vmem_capacity():
    try:
        return int(pltpu.get_tpu_info().vmem_capacity_bytes)
    except Exception:
        return 64 * 2**20  # conservative (v7x-sized) fallback


def _vmem_estimate(n, tq, c, cs, isz):
    lane_cs = _round_up(cs, 128)
    return int(
        2 * n * 2 * c * isz            # resident x slab block (double-buffered)
        + 2 * 2 * c * n * 4            # output block, f32 (double-buffered)
        + 8 * 2 * c * lane_cs * isz    # 4 weight blocks (double-buffered, lane-padded)
        + n * lane_cs * (isz + 4)      # theta (op dtype) + accumulator (f32) scratch
        + n * 128 * 4                  # padding-bias scratch (lane-padded column)
        + 3 * n * tq * 4               # scores / exp f32 working set
        + n * tq * isz                 # exp cast to the MXU operand dtype
        + 4 * tq * lane_cs * 4)        # phi / g tiles


def _pick_q_tile(n, max_tile, budget, c, cs, isz):
    """Largest multiple of 128 dividing n that is <= max_tile and fits the budget."""
    t = max(128, min((max_tile // 128) * 128, n))
    while n % t:
        t -= 128
    while t > 128 and _vmem_estimate(n, t, c, cs, isz) > budget:
        t -= 128
        while n % t:
            t -= 128
    return t


def _block_diag2(a):
    """[[a, 0], [0, a]] -- reproduces the .view() half-split as channel mixing."""
    z = jnp.zeros_like(a)
    return jnp.concatenate(
        [jnp.concatenate([a, z], axis=1), jnp.concatenate([z, a], axis=1)], axis=0)


def _nonlocal_kernel(hw2, tq, op_dtype,
                     x_ref, w_th_ref, w_phi_ref, w_g_ref, w_mask_ref,
                     o_ref, th_sc, acc_sc, bias_sc):
    """Grid = (batch, q_split, inner q tile).

    Per-block shapes:
      x_ref      : (1, N, 2C)  stacked-half, spatial-major x slab (resident)
      w_th_ref   : (2C, cs)    block-diag theta weight (transposed)
      w_phi_ref  : (2C, cs)    block-diag phi weight (transposed)
      w_g_ref    : (2C, cs)    block-diag g weight (transposed)
      w_mask_ref : (2C, cs)    block-diag mask weight
      o_ref      : (1, 1, 2C, N) per-split partial mask output (written at last q)
      th_sc      : (N, cs)     theta, spatial-major (persistent per (b, split))
      acc_sc     : (N, cs)     f32 attention-output accumulator
      bias_sc    : (N, 1)      f32 additive softmax bias for zero-padded p rows
    """
    sp = pl.program_id(1)
    qi = pl.program_id(2)
    nq_inner = pl.num_programs(2)
    n = x_ref.shape[1]
    f32 = jnp.float32
    padded = n != hw2  # static

    @pl.when(qi == 0)
    def _init():
        xs = x_ref[0]                                                   # (N, 2C)
        th = jnp.dot(xs, w_th_ref[...], preferred_element_type=f32)    # (N, cs)
        th_sc[...] = th.astype(th_sc.dtype)
        acc_sc[...] = jnp.zeros_like(acc_sc)
        if padded:
            p_idx = lax.broadcasted_iota(jnp.int32, (n, 1), 0)
            bias_sc[...] = jnp.where(p_idx < hw2, f32(0.0), f32(-1e30))

    # q-column tile sliced from the resident slab: no extra HBM traffic.
    start = pl.multiple_of((sp * nq_inner + qi) * tq, 128)
    xt = x_ref[0, pl.ds(start, tq), :]                                  # (Tq, 2C)
    phi_t = jnp.dot(xt, w_phi_ref[...], preferred_element_type=f32)    # (Tq, cs)
    g_t = jnp.dot(xt, w_g_ref[...], preferred_element_type=f32)        # (Tq, cs)

    # Attention scores: same NT dot_general form as flash q.k^T (no transposes).
    scores = lax.dot_general(
        th_sc[...], phi_t.astype(th_sc.dtype),
        dimension_numbers=(((1,), (1,)), ((), ())),
        preferred_element_type=f32)                                     # (N, Tq)
    if padded:
        scores = scores + bias_sc[...]          # -1e30 on zero-padded p rows

    # Softmax over the p axis (axis 0) is exact within a column tile.
    m = jnp.max(scores, axis=0, keepdims=True)                          # (1, Tq)
    e = jnp.exp(scores - m)                                             # (N, Tq) f32
    s = jnp.sum(e, axis=0, keepdims=True)                               # (1, Tq)
    if op_dtype == jnp.dtype(jnp.float32):
        inv_s = 1.0 / s
    else:
        inv_s = pl.reciprocal(s, approx=True)                           # EUP slot
    e_op = (e * inv_s).astype(op_dtype)                                 # (N, Tq)

    # acc[p, i] += sum_{q in tile} softmax[p, q] * g[q, i]  (NN matmul).
    acc_sc[...] += jnp.dot(e_op, g_t.astype(op_dtype),
                           preferred_element_type=f32)                  # (N, cs)

    @pl.when(qi == nq_inner - 1)
    def _finalize():
        mask = lax.dot_general(
            w_mask_ref[...], acc_sc[...].astype(op_dtype),
            dimension_numbers=(((1,), (1,)), ((), ())),
            preferred_element_type=f32)                                 # (2C, N)
        o_ref[0, 0] = mask.astype(o_ref.dtype)                          # lane-dense


@functools.partial(jax.jit, static_argnames=("mxu_dtype", "max_q_tile", "q_splits"))
def nonlocal_block(x, w_phi, w_theta, w_g, w_mask, *,
                   mxu_dtype=jnp.bfloat16, max_q_tile=None, q_splits=None):
    b, c, h, w = x.shape
    assert c % 2 == 0 and (h * w) % 2 == 0, "NonLocalBlock .view() needs even c, h*w"
    hw = h * w
    hw2 = hw // 2                      # viewed spatial length (.view(b, c, -1))
    c2 = c // 2
    cs = 2 * c2                        # viewed channel count (== c for even c)
    n = _round_up(hw2, 128)            # lane-aligned spatial length per half
    op_dtype = jnp.dtype(mxu_dtype)
    isz = op_dtype.itemsize

    # ---- generation-aware tile / VMEM selection --------------------------------
    vmem_cap = _tpu_vmem_capacity()
    budget = (vmem_cap * 3) // 4
    if max_q_tile is None:
        max_q_tile = 256 if vmem_cap <= 64 * 2**20 else 512
    tq = _pick_q_tile(n, max_q_tile, budget, c, cs, isz)
    n_qt = n // tq

    # Split q tiles across two accumulators on 2-TensorCore parts (v7x heuristic)
    # so batch=1 still uses both cores; partial masks are summed in the wrapper.
    if q_splits is None:
        q_splits = 2 if (vmem_cap <= 64 * 2**20 and n_qt >= 2 and n_qt % 2 == 0) else 1
    q_splits = int(q_splits)
    if q_splits < 1 or n_qt % q_splits != 0:
        q_splits = 1
    n_qt_inner = n_qt // q_splits

    # ---- wrapper-side layout plumbing (pure XLA) --------------------------------
    # Stacked-half, spatial-major slab; padding rows MUST stay exactly zero
    # (padded q columns then contribute nothing; padded p rows use the bias).
    x_flat = x.reshape(b, c, hw)
    x_stack = jnp.concatenate([x_flat[:, :, :hw2], x_flat[:, :, hw2:]], axis=1)
    x_stack = jnp.transpose(x_stack, (0, 2, 1))                       # (b, hw2, 2c)
    if n != hw2:
        x_stack = jnp.pad(x_stack, ((0, 0), (0, n - hw2), (0, 0)))
    x_stack = x_stack.astype(op_dtype)
    # TODO(synk): avoid materializing x_stack in HBM (allow_input_fusion).

    w_th_t = _block_diag2(w_theta.T).astype(op_dtype)                 # (2C, cs)
    w_phi_t = _block_diag2(w_phi.T).astype(op_dtype)                  # (2C, cs)
    w_g_t = _block_diag2(w_g.T).astype(op_dtype)                      # (2C, cs)
    w_mask_bd = _block_diag2(w_mask).astype(op_dtype)                 # (2C, cs)

    # ---- compiler hints ----------------------------------------------------------
    flops = int(b * (2 * n * 2 * c * cs * (q_splits + 2)     # theta (+splits), phi, g
                     + 4 * n * n * cs                        # scores + value accum
                     + q_splits * 2 * 2 * c * cs * n))       # mask conv
    transcendentals = int(b * (n * n + n))
    bytes_accessed = int(b * n * 2 * c * isz + 4 * 2 * c * cs * isz
                         + b * q_splits * 2 * c * n * 4)

    kernel = functools.partial(_nonlocal_kernel, hw2, tq, op_dtype)
    parts = pl.pallas_call(
        kernel,
        out_shape=jax.ShapeDtypeStruct((b, q_splits, 2 * c, n), jnp.float32),
        grid_spec=pltpu.PrefetchScalarGridSpec(
            num_scalar_prefetch=0,
            grid=(b, q_splits, n_qt_inner),
            in_specs=[
                pl.BlockSpec((1, n, 2 * c), lambda i, s, q: (i, 0, 0)),   # x slab
                pl.BlockSpec((2 * c, cs), lambda i, s, q: (0, 0)),        # theta^T
                pl.BlockSpec((2 * c, cs), lambda i, s, q: (0, 0)),        # phi^T
                pl.BlockSpec((2 * c, cs), lambda i, s, q: (0, 0)),        # g^T
                pl.BlockSpec((2 * c, cs), lambda i, s, q: (0, 0)),        # mask
            ],
            out_specs=pl.BlockSpec((1, 1, 2 * c, n), lambda i, s, q: (i, s, 0, 0)),
            scratch_shapes=[
                pltpu.VMEM((n, cs), op_dtype),      # theta (spatial-major)
                pltpu.VMEM((n, cs), jnp.float32),   # attention-output accumulator
                pltpu.VMEM((n, 1), jnp.float32),    # softmax padding bias
            ]),
        compiler_params=pltpu.CompilerParams(
            dimension_semantics=("parallel", "parallel", "arbitrary"),
            vmem_limit_bytes=int(budget)),
        cost_estimate=pl.CostEstimate(
            flops=flops, transcendentals=transcendentals,
            bytes_accessed=bytes_accessed),
    )(x_stack, w_th_t, w_phi_t, w_g_t, w_mask_bd)

    # Sum per-split partial masks, un-stack halves, full-precision residual add.
    mask_stack = jnp.sum(parts, axis=1)                                # (b, 2c, n)
    mask_flat = jnp.concatenate(
        [mask_stack[:, :c, :hw2], mask_stack[:, c:, :hw2]], axis=2)    # (b, c, hw)
    out = mask_flat.reshape(b, c, h, w) + x.astype(jnp.float32)
    return out.astype(x.dtype)


def nonlocal_ref(x, w_phi, w_theta, w_g, w_mask):
    """Pure-JAX reference reproducing the PyTorch forward literally."""
    b, c, h, w = x.shape
    c2 = c // 2

    def conv1x1(inp, wt):  # wt: (oc, ic), inp: (b, ic, h, w)
        return jnp.einsum('oi,bihw->bohw', wt, inp)

    x_phi = conv1x1(x, w_phi).reshape(b, c, -1)
    x_theta = jnp.transpose(conv1x1(x, w_theta).reshape(b, c, -1), (0, 2, 1))
    x_g = jnp.transpose(conv1x1(x, w_g).reshape(b, c, -1), (0, 2, 1))
    mul = jnp.einsum('bpc,bcq->bpq', x_theta, x_phi)
    mul = jax.nn.softmax(mul, axis=1)
    out = jnp.einsum('bpq,bqc->bpc', mul, x_g)
    out = jnp.transpose(out, (0, 2, 1)).reshape(b, c2, h, w)
    mask = conv1x1(out, w_mask)
    return mask + x


if __name__ == "__main__":
    key = jax.random.PRNGKey(0)
    k1, k2 = jax.random.split(key, 2)

    def make_inputs(kx, b, c, h, w):
        c2 = c // 2
        ks = jax.random.split(kx, 5)
        x = jax.random.normal(ks[0], (b, c, h, w), dtype=jnp.float32)
        w_phi = jax.random.normal(ks[1], (c2, c), jnp.float32) / jnp.sqrt(c)
        w_theta = jax.random.normal(ks[2], (c2, c), jnp.float32) / jnp.sqrt(c)
        w_g = jax.random.normal(ks[3], (c2, c), jnp.float32) / jnp.sqrt(c)
        w_mask = jax.random.normal(ks[4], (c, c2), jnp.float32) / jnp.sqrt(c2)
        return x, w_phi, w_theta, w_g, w_mask

    # 1) Lane-aligned spatial (16x16 -> hw2 = 128), f32 MXU operands: tight check.
    args = make_inputs(k1, 2, 4, 16, 16)
    out = jax.block_until_ready(nonlocal_block(*args, mxu_dtype=jnp.float32))
    ref = jax.block_until_ready(nonlocal_ref(*args))
    assert out.shape == (2, 4, 16, 16)
    assert jnp.allclose(out, ref, atol=5e-3, rtol=5e-3), (
        float(jnp.max(jnp.abs(out - ref))))

    # 2) Default path (bf16 MXU operands, f32 accumulation / softmax / residual):
    #    loose smoke check; the f32 run above is the tight semantic check.
    out_bf16 = jax.block_until_ready(nonlocal_block(*args))
    assert jnp.allclose(out_bf16, ref, atol=1e-1, rtol=1e-1), (
        float(jnp.max(jnp.abs(out_bf16 - ref))))

    # 3) Non-aligned spatial (18x18 -> hw2 = 162, padded to 256), two q tiles split
    #    across two accumulators: exercises the padding bias + q-split partial sums.
    args3 = make_inputs(k2, 1, 8, 18, 18)
    out3 = jax.block_until_ready(
        nonlocal_block(*args3, mxu_dtype=jnp.float32, max_q_tile=128, q_splits=2))
    ref3 = jax.block_until_ready(nonlocal_ref(*args3))
    assert out3.shape == (1, 8, 18, 18)
    assert jnp.allclose(out3, ref3, atol=5e-3, rtol=5e-3), (
        float(jnp.max(jnp.abs(out3 - ref3))))

    # 4) Same inputs, single split with two inner q tiles: exercises the
    #    multi-step accumulation path of one accumulator.
    out4 = jax.block_until_ready(
        nonlocal_block(*args3, mxu_dtype=jnp.float32, max_q_tile=128, q_splits=1))
    assert jnp.allclose(out4, ref3, atol=5e-3, rtol=5e-3), (
        float(jnp.max(jnp.abs(out4 - ref3))))

    print("KERNEL_OK")
</pallas_src>

<mosaic_0001>
module attributes {stable_mosaic.version = 11 : i64} {
  func.func @_nonlocal_kernel(%arg0: i32, %arg1: i32, %arg2: i32, %arg3: memref<1x128x8xf32, #tpu.memory_space<vmem>>, %arg4: memref<8x4xf32, #tpu.memory_space<vmem>>, %arg5: memref<8x4xf32, #tpu.memory_space<vmem>>, %arg6: memref<8x4xf32, #tpu.memory_space<vmem>>, %arg7: memref<8x4xf32, #tpu.memory_space<vmem>>, %arg8: memref<1x1x8x128xf32, #tpu.memory_space<vmem>>, %arg9: memref<128x4xf32, #tpu.memory_space<vmem>>, %arg10: memref<128x4xf32, #tpu.memory_space<vmem>>, %arg11: memref<128x1xf32, #tpu.memory_space<vmem>>) attributes {dimension_semantics = [#tpu.dimension_semantics<parallel>, #tpu.dimension_semantics<parallel>, #tpu.dimension_semantics<arbitrary>], iteration_bounds = array<i64: 2, 1, 1>, scalar_prefetch = 0 : i64, scratch_operands = 3 : i64, tpu.core_type = #tpu.core_type<tc>, window_params = [{transform_indices = @transform_0, window_bounds = array<i64: 1, 128, 8>}, {pipeline_mode = #tpu.pipeline_mode<synchronous>, transform_indices = @transform_1, window_bounds = array<i64: 8, 4>}, {pipeline_mode = #tpu.pipeline_mode<synchronous>, transform_indices = @transform_2, window_bounds = array<i64: 8, 4>}, {pipeline_mode = #tpu.pipeline_mode<synchronous>, transform_indices = @transform_3, window_bounds = array<i64: 8, 4>}, {pipeline_mode = #tpu.pipeline_mode<synchronous>, transform_indices = @transform_4, window_bounds = array<i64: 8, 4>}, {transform_indices = @transform_5, window_bounds = array<i64: 1, 1, 8, 128>}]} {
    %c0_i32 = arith.constant 0 : i32
    %0 = arith.cmpi eq, %arg2, %c0_i32 : i32
    %1 = arith.extui %0 : i1 to i32
    %c0_i32_0 = arith.constant 0 : i32
    %2 = arith.cmpi ne, %1, %c0_i32_0 : i32
    scf.if %2 {
      %c0_20 = arith.constant 0 : index
      %c0_21 = arith.constant 0 : index
      %c0_22 = arith.constant 0 : index
      %34 = vector.load %arg3[%c0_20, %c0_21, %c0_22] : memref<1x128x8xf32, #tpu.memory_space<vmem>>, vector<1x128x8xf32>
      %35 = vector.shape_cast %34 : vector<1x128x8xf32> to vector<128x8xf32>
      %c0_23 = arith.constant 0 : index
      %c0_24 = arith.constant 0 : index
      %36 = vector.load %arg4[%c0_23, %c0_24] : memref<8x4xf32, #tpu.memory_space<vmem>>, vector<8x4xf32>
      %cst_25 = arith.constant dense<0.000000e+00> : vector<128x4xf32>
      %37 = tpu.matmul %35, %36, %cst_25 {dimension_numbers = #tpu.dot_dimension_numbers<[1], [0], [0], [1], [0, 0, 1, 1], [], []>} : vector<128x8xf32>, vector<8x4xf32>, vector<128x4xf32> -> vector<128x4xf32>
      %c0_26 = arith.constant 0 : index
      %c0_27 = arith.constant 0 : index
      %38 = vector.load %arg9[%c0_26, %c0_27] : memref<128x4xf32, #tpu.memory_space<vmem>>, vector<128x4xf32>
      tpu.vector_store %arg9[%c0_26, %c0_27], %37 {strides = array<i32>} : memref<128x4xf32, #tpu.memory_space<vmem>>, vector<128x4xf32>,
      %cst_28 = arith.constant 0.000000e+00 : f32
      %39 = vector.broadcast %cst_28 : f32 to vector<128x4xf32>
      %c0_29 = arith.constant 0 : index
      %c0_30 = arith.constant 0 : index
      %40 = vector.load %arg10[%c0_29, %c0_30] : memref<128x4xf32, #tpu.memory_space<vmem>>, vector<128x4xf32>
      tpu.vector_store %arg10[%c0_29, %c0_30], %39 {strides = array<i32>} : memref<128x4xf32, #tpu.memory_space<vmem>>, vector<128x4xf32>,
    } else {
    }
    %c1_i32 = arith.constant 1 : i32
    %3 = arith.muli %arg1, %c1_i32 : i32
    %4 = arith.addi %3, %arg2 : i32
    %c128_i32 = arith.constant 128 : i32
    %5 = arith.muli %4, %c128_i32 : i32
    %6 = tpu.assume_multiple %5, 128 : i32
    %c0 = arith.constant 0 : index
    %7 = arith.index_cast %6 : i32 to index
    %c0_1 = arith.constant 0 : index
    %8 = vector.load %arg3[%c0, %7, %c0_1] : memref<1x128x8xf32, #tpu.memory_space<vmem>>, vector<1x128x8xf32>
    %9 = vector.shape_cast %8 : vector<1x128x8xf32> to vector<128x8xf32>
    %c0_2 = arith.constant 0 : index
    %c0_3 = arith.constant 0 : index
    %10 = vector.load %arg5[%c0_2, %c0_3] : memref<8x4xf32, #tpu.memory_space<vmem>>, vector<8x4xf32>
    %cst = arith.constant dense<0.000000e+00> : vector<128x4xf32>
    %11 = tpu.matmul %9, %10, %cst {dimension_numbers = #tpu.dot_dimension_numbers<[1], [0], [0], [1], [0, 0, 1, 1], [], []>} : vector<128x8xf32>, vector<8x4xf32>, vector<128x4xf32> -> vector<128x4xf32>
    %c0_4 = arith.constant 0 : index
    %c0_5 = arith.constant 0 : index
    %12 = vector.load %arg6[%c0_4, %c0_5] : memref<8x4xf32, #tpu.memory_space<vmem>>, vector<8x4xf32>
    %cst_6 = arith.constant dense<0.000000e+00> : vector<128x4xf32>
    %13 = tpu.matmul %9, %12, %cst_6 {dimension_numbers = #tpu.dot_dimension_numbers<[1], [0], [0], [1], [0, 0, 1, 1], [], []>} : vector<128x8xf32>, vector<8x4xf32>, vector<128x4xf32> -> vector<128x4xf32>
    %c0_7 = arith.constant 0 : index
    %c0_8 = arith.constant 0 : index
    %14 = vector.load %arg9[%c0_7, %c0_8] : memref<128x4xf32, #tpu.memory_space<vmem>>, vector<128x4xf32>
    %cst_9 = arith.constant dense<0.000000e+00> : vector<128x128xf32>
    %15 = tpu.matmul %14, %11, %cst_9 {dimension_numbers = #tpu.dot_dimension_numbers<[1], [1], [0], [0], [0, 0, 1, 0], [], []>} : vector<128x4xf32>, vector<128x4xf32>, vector<128x128xf32> -> vector<128x128xf32>
    %cst_10 = arith.constant dense<0xFF800000> : vector<128xf32>
    %16 = vector.multi_reduction <maximumf>, %15, %cst_10 [0] : vector<128x128xf32> to vector<128xf32>
    %17 = vector.shape_cast %16 : vector<128xf32> to vector<1x128xf32>
    %18 = vector.broadcast %17 : vector<1x128xf32> to vector<128x128xf32>
    %19 = arith.subf %15, %18 : vector<128x128xf32>
    %20 = math.exp %19 : vector<128x128xf32>
    %cst_11 = arith.constant dense<0.000000e+00> : vector<128xf32>
    %21 = vector.multi_reduction <add>, %20, %cst_11 [0] : vector<128x128xf32> to vector<128xf32>
    %22 = vector.shape_cast %21 : vector<128xf32> to vector<1x128xf32>
    %cst_12 = arith.constant 1.000000e+00 : f32
    %23 = vector.broadcast %cst_12 : f32 to vector<1x128xf32>
    %24 = arith.divf %23, %22 : vector<1x128xf32>
    %25 = vector.broadcast %24 : vector<1x128xf32> to vector<128x128xf32>
    %26 = arith.mulf %20, %25 : vector<128x128xf32>
    %c0_13 = arith.constant 0 : index
    %c0_14 = arith.constant 0 : index
    %27 = vector.load %arg10[%c0_13, %c0_14] : memref<128x4xf32, #tpu.memory_space<vmem>>, vector<128x4xf32>
    %cst_15 = arith.constant dense<0.000000e+00> : vector<128x4xf32>
    %28 = tpu.matmul %26, %13, %cst_15 {dimension_numbers = #tpu.dot_dimension_numbers<[1], [0], [0], [1], [0, 0, 1, 1], [], []>} : vector<128x128xf32>, vector<128x4xf32>, vector<128x4xf32> -> vector<128x4xf32>
    %29 = arith.addf %27, %28 : vector<128x4xf32>
    %c0_16 = arith.constant 0 : index
    %c0_17 = arith.constant 0 : index
    %30 = vector.load %arg10[%c0_16, %c0_17] : memref<128x4xf32, #tpu.memory_space<vmem>>, vector<128x4xf32>
    tpu.vector_store %arg10[%c0_16, %c0_17], %29 {strides = array<i32>} : memref<128x4xf32, #tpu.memory_space<vmem>>, vector<128x4xf32>,
    %c0_i32_18 = arith.constant 0 : i32
    %31 = arith.cmpi eq, %arg2, %c0_i32_18 : i32
    %32 = arith.extui %31 : i1 to i32
    %c0_i32_19 = arith.constant 0 : i32
    %33 = arith.cmpi ne, %32, %c0_i32_19 : i32
    scf.if %33 {
      %c0_20 = arith.constant 0 : index
      %c0_21 = arith.constant 0 : index
      %34 = vector.load %arg7[%c0_20, %c0_21] : memref<8x4xf32, #tpu.memory_space<vmem>>, vector<8x4xf32>
      %c0_22 = arith.constant 0 : index
      %c0_23 = arith.constant 0 : index
      %35 = vector.load %arg10[%c0_22, %c0_23] : memref<128x4xf32, #tpu.memory_space<vmem>>, vector<128x4xf32>
      %cst_24 = arith.constant dense<0.000000e+00> : vector<8x128xf32>
      %36 = tpu.matmul %34, %35, %cst_24 {dimension_numbers = #tpu.dot_dimension_numbers<[1], [1], [0], [0], [0, 0, 1, 0], [], []>} : vector<8x4xf32>, vector<128x4xf32>, vector<8x128xf32> -> vector<8x128xf32>
      %c0_25 = arith.constant 0 : index
      %c0_26 = arith.constant 0 : index
      %c0_27 = arith.constant 0 : index
      %c0_28 = arith.constant 0 : index
      %37 = vector.load %arg8[%c0_25, %c0_26, %c0_27, %c0_28] : memref<1x1x8x128xf32, #tpu.memory_space<vmem>>, vector<1x1x8x128xf32>
      %38 = vector.shape_cast %37 : vector<1x1x8x128xf32> to vector<8x128xf32>
      %39 = vector.shape_cast %36 : vector<8x128xf32> to vector<1x1x8x128xf32>
      tpu.vector_store %arg8[%c0_25, %c0_26, %c0_27, %c0_28], %39 {strides = array<i32>} : memref<1x1x8x128xf32, #tpu.memory_space<vmem>>, vector<1x1x8x128xf32>,
    } else {
    }
    return
  }
  func.func @transform_0(%arg0: i32, %arg1: i32, %arg2: i32) -> (i32, i32, i32) {
    %c0_i32 = arith.constant 0 : i32
    %c0_i32_0 = arith.constant 0 : i32
    %c0_i32_1 = arith.constant 0 : i32
    return %arg0, %c0_i32, %c0_i32_0 : i32, i32, i32
  }
  func.func @transform_1(%arg0: i32, %arg1: i32, %arg2: i32) -> (i32, i32) {
    %c0_i32 = arith.constant 0 : i32
    %c0_i32_0 = arith.constant 0 : i32
    %c0_i32_1 = arith.constant 0 : i32
    return %c0_i32, %c0_i32_0 : i32, i32
  }
  func.func @transform_2(%arg0: i32, %arg1: i32, %arg2: i32) -> (i32, i32) {
    %c0_i32 = arith.constant 0 : i32
    %c0_i32_0 = arith.constant 0 : i32
    %c0_i32_1 = arith.constant 0 : i32
    return %c0_i32, %c0_i32_0 : i32, i32
  }
  func.func @transform_3(%arg0: i32, %arg1: i32, %arg2: i32) -> (i32, i32) {
    %c0_i32 = arith.constant 0 : i32
    %c0_i32_0 = arith.constant 0 : i32
    %c0_i32_1 = arith.constant 0 : i32
    return %c0_i32, %c0_i32_0 : i32, i32
  }
  func.func @transform_4(%arg0: i32, %arg1: i32, %arg2: i32) -> (i32, i32) {
    %c0_i32 = arith.constant 0 : i32
    %c0_i32_0 = arith.constant 0 : i32
    %c0_i32_1 = arith.constant 0 : i32
    return %c0_i32, %c0_i32_0 : i32, i32
  }
  func.func @transform_5(%arg0: i32, %arg1: i32, %arg2: i32) -> (i32, i32, i32, i32) {
    %c0_i32 = arith.constant 0 : i32
    %c0_i32_0 = arith.constant 0 : i32
    %c0_i32_1 = arith.constant 0 : i32
    return %arg0, %arg1, %c0_i32, %c0_i32_0 : i32, i32, i32, i32
  }
}

</mosaic_0001>

<bundles_post_ra>
// kernel: nonlocal_block.1
= control target key start
LH: loop header
LB: loop body
LE: loop exit
PB: predicated region body
PF: predicated region fallthrough
CT: control target
= control target key end

     0   :  { %s1423_s18 = smov 0   ;;  %s1425_s19 = smov 0   ;;  %s1749_s0 = inlined_call_operand.vmem [shape: f32[2,128,8], index: 0, kind: input, shape index: {}]   ;;  %s1750_s1 = inlined_call_operand.vmem [shape: f32[8,4], index: 1, kind: input, shape index: {}]   ;;  %s1751_s2 = inlined_call_operand.vmem [shape: f32[8,4], index: 2, kind: input, shape index: {}]   ;;  %s1752_s3 = inlined_call_operand.vmem [shape: f32[8,4], index: 3, kind: input, shape index: {}]   ;;  %s1753_s4 = inlined_call_operand.vmem [shape: f32[8,4], index: 4, kind: input, shape index: {}]   ;;  %s1754_s5 = inlined_call_operand.vmem [shape: f32[2,1,8,128], index: 5, kind: output, shape index: {}]  }
   0x1   :  { %s1427_s20 = smov 0  }
   0x2 LB: > { %s34_s21 = sadd.s32 1, %s1386_s19  ;;  %p1203_p0 = scmp.ge.s32.totalorder %s1390_s20, 1  ;;  %s1390_s20 = sphi %s1427_s20, %s15_s20   ;;  %s1386_s19 = sphi %s1425_s19, %s1756_s19   ;;  %s1382_s18 = sphi %s1423_s18, %s1755_s18  }
   0x3   : > { %p36_p1 = scmp.ge.s32.totalorder %s34_s21, 2  ;;  %p208_p2 = scmp.lt.s32.totalorder %s1390_s20, 3 }
   0x5   : > { %s1758_s21 = smov (%p36_p1, %s34_s21), 0  ;;  %p209_p3 = pnand %p1203_p0, %p208_p2 }
   0x6   : > { %p238_p4 = scmp.lt.s32.totalorder (!%p209_p3), %s1382_s18, 1 }
   0x7   : > { %212 = sbr.rel (%p209_p3) target bundleno = 1130 (0x46a), region = 40 }
   0xc   : > { %v270_v0 = vld [vmem:[%s1750_s1] sm:$0xff]  ;;  %s1760_s18 = smov (!%p238_p4, %s1382_s18), 1  ;;  %vm271_vm0 = vcmask 64512   ;;  %vm385_vm1 = vcmask 31744  }
   0xd   : > { %v437_v1 = vld [vmem:[%s1751_s2] sm:$0xff]  ;;  %1307 = vmatpush.msra.mxu1 %v270_v0  ;;  %1308 = vmatpush.msra.mxu2 %v270_v0  ;;  %s1306_s26 = sshll.u32 %s1760_s18, 7  ;;  %s1206_s9 = sshll.u32 %s1760_s18, 3 }
   0xe   : > { %335 = vmatpush.msra.mxu0 %v270_v0  ;;  %s1453_s29 = scalar_lea.vmem %s1749_s0, %s1306_s26  ;;  %v552_v28 = vld [vmem:[%s1752_s3] sm:$0xff]  ;;  %s249_s12 = scalar_lea.vmem %s1754_s5, %s1206_s9 }
   0xf   : > { %502 = vmatpush.msrb.mxu1 %v437_v1  ;;  %v1456_v2 = vld [vmem:[%s1453_s29 + $0x38] sm:$0xff]  ;;  %v421_v3 = vld [vmem:[%s1453_s29] sm:$0xff]  ;;  %v422_v5 = vld [vmem:[%s1453_s29 + $0x8] sm:$0xff]  ;;  %568 = vmatpush.msrb.mxu2 %v552_v28 }
  0x10   : > { %1214 = vmatmul.msk.f32.vlgmr.msra.gmra.mxu1 %vm271_vm0, %v1456_v2  ;;  %1207 = vmatmul.msk.f32.vlgmr.msra.gmra.mxu0 %vm271_vm0, %v421_v3  ;;  %v1463_v4 = vld [vmem:[%s1453_s29 + $0x40] sm:$0xff]  ;;  %v423_v6 = vld [vmem:[%s1453_s29 + $0x10] sm:$0xff]  ;;  %v424_v7 = vld [vmem:[%s1453_s29 + $0x18] sm:$0xff] }
  0x11   : > { %v425_v8 = vld [vmem:[%s1453_s29 + $0x20] sm:$0xff]  ;;  %v426_v9 = vld [vmem:[%s1453_s29 + $0x28] sm:$0xff]  ;;  %v427_v10 = vld [vmem:[%s1453_s29 + $0x30] sm:$0xff] }
  0x12   : > { %v430_v11 = vld [vmem:[%s1453_s29 + $0x48] sm:$0xff]  ;;  %v431_v12 = vld [vmem:[%s1453_s29 + $0x50] sm:$0xff]  ;;  %v1491_v13 = vld [vmem:[%s1453_s29 + $0x58] sm:$0xff] }
  0x13   : > { %1216 = vmatmul.msk.f32.vlgmr.msra.gmra.mxu2 %vm271_vm0, %v430_v11  ;;  %v1498_v14 = vld [vmem:[%s1453_s29 + $0x60] sm:$0xff]  ;;  %v1505_v15 = vld [vmem:[%s1453_s29 + $0x68] sm:$0xff]  ;;  %v1511_v16 = vld [vmem:[%s1453_s29 + $0x70] sm:$0xff] }
  0x14   : > { %v1517_v17 = vld [vmem:[%s1453_s29 + $0x78] sm:$0xff] }
  0x18   : > { %1215 = vmatmul.msk.f32.gmra.mxu1 %vm271_vm0, %v1463_v4  ;;  %1208 = vmatmul.msk.f32.gmra.mxu0 %vm271_vm0, %v422_v5 }
  0x1b   : > { %1217 = vmatmul.msk.f32.gmra.mxu2 %vm271_vm0, %v431_v12 }
  0x20   : > { %1223 = vmatmul.msk.f32.vlgmr.msrb.gmra.mxu1 %vm271_vm0, %v421_v3  ;;  %1209 = vmatmul.msk.f32.gmra.mxu0 %vm271_vm0, %v423_v6 }
  0x23   : > { %1218 = vmatmul.msk.f32.gmra.mxu2 %vm271_vm0, %v1491_v13 }
  0x28   : > { %1224 = vmatmul.msk.f32.gmra.mxu1 %vm271_vm0, %v422_v5  ;;  %1210 = vmatmul.msk.f32.gmra.mxu0 %vm271_vm0, %v424_v7 }
  0x2b   : > { %1219 = vmatmul.msk.f32.gmra.mxu2 %vm271_vm0, %v1498_v14 }
  0x30   : > { %1225 = vmatmul.msk.f32.gmra.mxu1 %vm271_vm0, %v423_v6  ;;  %1211 = vmatmul.msk.f32.gmra.mxu0 %vm271_vm0, %v425_v8 }
  0x33   : > { %1220 = vmatmul.msk.f32.gmra.mxu2 %vm271_vm0, %v1505_v15 }
  0x38   : > { %1226 = vmatmul.msk.f32.gmra.mxu1 %vm271_vm0, %v424_v7  ;;  %1212 = vmatmul.msk.f32.gmra.mxu0 %vm271_vm0, %v426_v9 }
  0x3b   : > { %1221 = vmatmul.msk.f32.gmra.mxu2 %vm271_vm0, %v1511_v16 }
  0x40   : > { %1227 = vmatmul.msk.f32.gmra.mxu1 %vm271_vm0, %v425_v8  ;;  %1213 = vmatmul.msk.f32.gmra.mxu0 %vm271_vm0, %v427_v10 }
  0x43   : > { %1222 = vmatmul.msk.f32.gmra.mxu2 %vm271_vm0, %v1517_v17 }
  0x48   : > { %1228 = vmatmul.msk.f32.gmra.mxu1 %vm271_vm0, %v426_v9 }
  0x4b   : > { %1239 = vmatmul.msk.f32.vlgmr.msrb.gmra.mxu2 %vm271_vm0, %v421_v3 }
  0x50   : > { %1229 = vmatmul.msk.f32.gmra.mxu1 %vm271_vm0, %v427_v10 }
  0x53   : > { %1240 = vmatmul.msk.f32.gmra.mxu2 %vm271_vm0, %v422_v5 }
  0x58   : > { %1230 = vmatmul.msk.f32.gmra.mxu1 %vm271_vm0, %v1456_v2 }
  0x5b   : > { %1241 = vmatmul.msk.f32.gmra.mxu2 %vm271_vm0, %v423_v6 }
  0x60   : > { %1231 = vmatmul.msk.f32.gmra.mxu1 %vm271_vm0, %v1463_v4 }
  0x63   : > { %1242 = vmatmul.msk.f32.gmra.mxu2 %vm271_vm0, %v424_v7 }
  0x68   : > { %1232 = vmatmul.msk.f32.gmra.mxu1 %vm271_vm0, %v430_v11 }
  0x6b   : > { %1243 = vmatmul.msk.f32.gmra.mxu2 %vm271_vm0, %v425_v8 }
  0x70   : > { %1233 = vmatmul.msk.f32.gmra.mxu1 %vm271_vm0, %v431_v12 }
  0x73   : > { %1244 = vmatmul.msk.f32.gmra.mxu2 %vm271_vm0, %v426_v9 }
  0x78   : > { %1234 = vmatmul.msk.f32.gmra.mxu1 %vm271_vm0, %v1491_v13 }
  0x7b   : > { %1245 = vmatmul.msk.f32.gmra.mxu2 %vm271_vm0, %v427_v10 }
  0x80   : > { %1235 = vmatmul.msk.f32.gmra.mxu1 %vm271_vm0, %v1498_v14 }
  0x83   : > { %1246 = vmatmul.msk.f32.gmra.mxu2 %vm271_vm0, %v1456_v2 }
  0x88   : > { %1236 = vmatmul.msk.f32.gmra.mxu1 %vm271_vm0, %v1505_v15 }
  0x8b   : > { %1247 = vmatmul.msk.f32.gmra.mxu2 %vm271_vm0, %v1463_v4 }
  0x8d   : > { %v358_v18 = vpop.f32.mrf.mxu1  ;;  %v337_v38 = vpop.f32.mrf.mxu0 }
  0x8e   : > { %393 = vst.msk [vmem:[#allocation2 + $0x38] sm:$0xff] %vm385_vm1, %v358_v18 }
  0x8f   : > { %386 = vst.msk [vmem:[#allocation2] sm:$0xff] %vm385_vm1, %v337_v38 }
  0x90   : > { %1237 = vmatmul.msk.f32.gmra.mxu1 %vm271_vm0, %v1511_v16 }
  0x93   : > { %1248 = vmatmul.msk.f32.gmra.mxu2 %vm271_vm0, %v430_v11 }
  0x95   : > { %v361_v19 = vpop.f32.mrf.mxu1  ;;  %v340_v40 = vpop.f32.mrf.mxu0  ;;  %v625_v1 = vld [vmem:[#allocation2 + $0x38] sm:$0xff] }
  0x96   : > { %394 = vst.msk [vmem:[#allocation2 + $0x40] sm:$0xff] %vm385_vm1, %v361_v19  ;;  %v364_v37 = vpop.f32.mrf.mxu2  ;;  %v618_v48 = vld [vmem:[#allocation2] sm:$0xff] }
  0x97   : > { %395 = vst.msk [vmem:[#allocation2 + $0x48] sm:$0xff] %vm385_vm1, %v364_v37 }
  0x98   : > { %1238 = vmatmul.msk.f32.gmra.mxu1 %vm271_vm0, %v1517_v17  ;;  %387 = vst.msk [vmem:[#allocation2 + $0x8] sm:$0xff] %vm385_vm1, %v340_v40 }
  0x9b   : > { %1249 = vmatmul.msk.f32.gmra.mxu2 %vm271_vm0, %v431_v12 }
  0x9d   : > { %v1533_v20 = vpop.f32.mrf.mxu1  ;;  %v343_v42 = vpop.f32.mrf.mxu0  ;;  %v626_v3 = vld [vmem:[#allocation2 + $0x40] sm:$0xff] }
  0x9e   : > { %v367_v39 = vpop.f32.mrf.mxu2  ;;  %388 = vst.msk [vmem:[#allocation2 + $0x10] sm:$0xff] %vm385_vm1, %v343_v42  ;;  %v627_v4 = vld [vmem:[#allocation2 + $0x48] sm:$0xff] }
  0x9f   : > { %396 = vst.msk [vmem:[#allocation2 + $0x50] sm:$0xff] %vm385_vm1, %v367_v39  ;;  %v619_v51 = vld [vmem:[#allocation2 + $0x8] sm:$0xff] }
  0xa3   : > { %1250 = vmatmul.msk.f32.gmra.mxu2 %vm271_vm0, %v1491_v13 }
  0xa5   : > { %v1535_v21 = vpop.f32.mrf.mxu1  ;;  %v346_v44 = vpop.f32.mrf.mxu0  ;;  %v620_v54 = vld [vmem:[#allocation2 + $0x10] sm:$0xff] }
  0xa6   : > { %v370_v41 = vpop.f32.mrf.mxu2  ;;  %389 = vst.msk [vmem:[#allocation2 + $0x18] sm:$0xff] %vm385_vm1, %v346_v44  ;;  %v628_v6 = vld [vmem:[#allocation2 + $0x50] sm:$0xff] }
  0xa7   : > { %397 = vst.msk [vmem:[#allocation2 + $0x58] sm:$0xff] %vm385_vm1, %v370_v41 }
  0xab   : > { %1251 = vmatmul.msk.f32.gmra.mxu2 %vm271_vm0, %v1498_v14 }
  0xad   : > { %v510_v22 = vpop.f32.mrf.mxu1  ;;  %v349_v46 = vpop.f32.mrf.mxu0  ;;  %v621_v56 = vld [vmem:[#allocation2 + $0x18] sm:$0xff] }
  0xae   : > { %v373_v43 = vpop.f32.mrf.mxu2  ;;  %390 = vst.msk [vmem:[#allocation2 + $0x20] sm:$0xff] %vm385_vm1, %v349_v46  ;;  %v629_v8 = vld [vmem:[#allocation2 + $0x58] sm:$0xff] }
  0xaf   : > { %398 = vst.msk [vmem:[#allocation2 + $0x60] sm:$0xff] %vm385_vm1, %v373_v43 }
  0xb3   : > { %1252 = vmatmul.msk.f32.gmra.mxu2 %vm271_vm0, %v1505_v15 }
  0xb5   : > { %v513_v23 = vpop.f32.mrf.mxu1  ;;  %v352_v49 = vpop.f32.mrf.mxu0  ;;  %v622_v58 = vld [vmem:[#allocation2 + $0x20] sm:$0xff] }
  0xb6   : > { %v376_v45 = vpop.f32.mrf.mxu2  ;;  %391 = vst.msk [vmem:[#allocation2 + $0x28] sm:$0xff] %vm385_vm1, %v352_v49  ;;  %v630_v10 = vld [vmem:[#allocation2 + $0x60] sm:$0xff] }
  0xb7   : > { %399 = vst.msk [vmem:[#allocation2 + $0x68] sm:$0xff] %vm385_vm1, %v376_v45 }
  0xbb   : > { %1253 = vmatmul.msk.f32.gmra.mxu2 %vm271_vm0, %v1511_v16 }
  0xbd   : > { %v516_v24 = vpop.f32.mrf.mxu1  ;;  %v355_v52 = vpop.f32.mrf.mxu0  ;;  %v623_v60 = vld [vmem:[#allocation2 + $0x28] sm:$0xff] }
  0xbe   : > { %v379_v47 = vpop.f32.mrf.mxu2  ;;  %392 = vst.msk [vmem:[#allocation2 + $0x30] sm:$0xff] %vm385_vm1, %v355_v52  ;;  %v631_v12 = vld [vmem:[#allocation2 + $0x68] sm:$0xff] }
  0xbf   : > { %400 = vst.msk [vmem:[#allocation2 + $0x70] sm:$0xff] %vm385_vm1, %v379_v47 }
  0xc3   : > { %1254 = vmatmul.msk.f32.gmra.mxu2 %vm271_vm0, %v1517_v17 }
  0xc5   : > { %v519_v25 = vpop.f32.mrf.mxu1  ;;  %v624_v62 = vld [vmem:[#allocation2 + $0x30] sm:$0xff] }
  0xc6   : > { %v382_v50 = vpop.f32.mrf.mxu2  ;;  %v632_v14 = vld [vmem:[#allocation2 + $0x70] sm:$0xff] }
  0xc7   : > { %401 = vst.msk [vmem:[#allocation2 + $0x78] sm:$0xff] %vm385_vm1, %v382_v50 }
  0xcd   : > { %v522_v26 = vpop.f32.mrf.mxu1 }
  0xce   : > { %v1595_v53 = vpop.f32.mrf.mxu2  ;;  %v633_v16 = vld [vmem:[#allocation2 + $0x78] sm:$0xff] }
  0xd5   : > { %v525_v27 = vpop.f32.mrf.mxu1 }
  0xd6   : > { %v573_v55 = vpop.f32.mrf.mxu2 }
  0xdd   : > { %v528_v29 = vpop.f32.mrf.mxu1 }
  0xde   : > { %v576_v57 = vpop.f32.mrf.mxu2 }
  0xe5   : > { %v531_v30 = vpop.f32.mrf.mxu1 }
  0xe6   : > { %v579_v59 = vpop.f32.mrf.mxu2 }
  0xed   : > { %v534_v31 = vpop.f32.mrf.mxu1 }
  0xee   : > { %v582_v61 = vpop.f32.mrf.mxu2 }
  0xf5   : > { %v537_v32 = vpop.f32.mrf.mxu1 }
  0xf6   : > { %v585_v63 = vpop.f32.mrf.mxu2 }
  0xfd   : > { %v540_v33 = vpop.f32.mrf.mxu1 }
  0xfe   : > { %v588_v0 = vpop.f32.mrf.mxu2 }
 0x105   : > { %v543_v34 = vpop.f32.mrf.mxu1 }
 0x106   : > { %v591_v2 = vpop.f32.mrf.mxu2 }
 0x10d   : > { %v546_v35 = vpop.f32.mrf.mxu1 }
 0x10e   : > { %v594_v5 = vpop.f32.mrf.mxu2 }
 0x115   : > { %v549_v36 = vpop.f32.mrf.mxu1 }
 0x116   : > { %1255 = vmatpush.xpose.msk.msra.mxu3 %vm385_vm1, %v549_v36  ;;  %v597_v7 = vpop.f32.mrf.mxu2 }
 0x11a   : > { %1256 = vmatpush.xpose.msk.msra.mxu3 %vm385_vm1, %v546_v35 }
 0x11e   : > { %1257 = vmatpush.xpose.msk.msra.mxu3 %vm385_vm1, %v543_v34  ;;  %v600_v9 = vpop.f32.mrf.mxu2 }
 0x122   : > { %1258 = vmatpush.xpose.msk.msra.mxu3 %vm385_vm1, %v540_v33 }
 0x126   : > { %1259 = vmatpush.xpose.msk.msra.mxu3 %vm385_vm1, %v537_v32  ;;  %v603_v11 = vpop.f32.mrf.mxu2 }
 0x12a   : > { %1260 = vmatpush.xpose.msk.msra.mxu3 %vm385_vm1, %v534_v31 }
 0x12e   : > { %1261 = vmatpush.xpose.msk.msra.mxu3 %vm385_vm1, %v531_v30  ;;  %v606_v13 = vpop.f32.mrf.mxu2 }
 0x132   : > { %1262 = vmatpush.xpose.msk.msra.mxu3 %vm385_vm1, %v528_v29 }
 0x136   : > { %1263 = vmatpush.xpose.msk.msra.mxu3 %vm385_vm1, %v525_v27  ;;  %v609_v15 = vpop.f32.mrf.mxu2 }
 0x13a   : > { %1264 = vmatpush.xpose.msk.msra.mxu3 %vm385_vm1, %v522_v26 }
 0x13e   : > { %1265 = vmatpush.xpose.msk.msra.mxu3 %vm385_vm1, %v519_v25  ;;  %v612_v17 = vpop.f32.mrf.mxu2 }
 0x142   : > { %1266 = vmatpush.xpose.msk.msra.mxu3 %vm385_vm1, %v516_v24 }
 0x146   : > { %1267 = vmatpush.xpose.msk.msra.mxu3 %vm385_vm1, %v513_v23  ;;  %v615_v18 = vpop.f32.mrf.mxu2 }
 0x147   : > { %933 = vmatpush.msrb.mxu0 %v615_v18 }
 0x149   : > { %934 = vmatpush.msrb.mxu0 %v612_v17 }
 0x14a   : > { %1268 = vmatpush.xpose.msk.msra.mxu3 %vm385_vm1, %v510_v22 }
 0x14b   : > { %935 = vmatpush.msrb.mxu0 %v609_v15 }
 0x14d   : > { %936 = vmatpush.msrb.mxu0 %v606_v13 }
 0x14e   : > { %1269 = vmatpush.xpose.msk.msra.mxu3 %vm385_vm1, %v1535_v21 }
 0x14f   : > { %937 = vmatpush.msrb.mxu0 %v603_v11 }
 0x151   : > { %938 = vmatpush.msrb.mxu0 %v600_v9 }
 0x152   : > { %1270 = vmatpush.xpose.msk.msra.mxu3 %vm385_vm1, %v1533_v20 }
 0x153   : > { %939 = vmatpush.msrb.mxu0 %v597_v7 }
 0x155   : > { %1271 = vmatmul.msk.f32.vlgmr.msra.gmra.mxu3 %vm385_vm1, %v618_v48  ;;  %940 = vmatpush.msrb.mxu0 %v594_v5 }
 0x157   : > { %941 = vmatpush.msrb.mxu0 %v591_v2 }
 0x159   : > { %942 = vmatpush.msrb.mxu0 %v588_v0 }
 0x15b   : > { %943 = vmatpush.msrb.mxu0 %v585_v63 }
 0x15d   : > { %1272 = vmatmul.msk.f32.gmra.mxu3 %vm385_vm1, %v619_v51  ;;  %944 = vmatpush.msrb.mxu0 %v582_v61 }
 0x15f   : > { %945 = vmatpush.msrb.mxu0 %v579_v59 }
 0x161   : > { %946 = vmatpush.msrb.mxu0 %v576_v57 }
 0x163   : > { %947 = vmatpush.msrb.mxu0 %v573_v55 }
 0x165   : > { %1273 = vmatmul.msk.f32.gmra.mxu3 %vm385_vm1, %v620_v54  ;;  %948 = vmatpush.msrb.mxu0 %v1595_v53 }
 0x16d   : > { %1274 = vmatmul.msk.f32.gmra.mxu3 %vm385_vm1, %v621_v56 }
 0x175   : > { %1275 = vmatmul.msk.f32.gmra.mxu3 %vm385_vm1, %v622_v58 }
 0x17d   : > { %1276 = vmatmul.msk.f32.gmra.mxu3 %vm385_vm1, %v623_v60 }
 0x185   : > { %1277 = vmatmul.msk.f32.gmra.mxu3 %vm385_vm1, %v624_v62 }
 0x18d   : > { %1278 = vmatmul.msk.f32.gmra.mxu3 %vm385_vm1, %v625_v1 }
 0x195   : > { %1279 = vmatmul.msk.f32.gmra.mxu3 %vm385_vm1, %v626_v3 }
 0x19d   : > { %1280 = vmatmul.msk.f32.gmra.mxu3 %vm385_vm1, %v627_v4 }
 0x1a5   : > { %1281 = vmatmul.msk.f32.gmra.mxu3 %vm385_vm1, %v628_v6 }
 0x1ad   : > { %1282 = vmatmul.msk.f32.gmra.mxu3 %vm385_vm1, %v629_v8 }
 0x1b5   : > { %1283 = vmatmul.msk.f32.gmra.mxu3 %vm385_vm1, %v630_v10 }
 0x1bd   : > { %1284 = vmatmul.msk.f32.gmra.mxu3 %vm385_vm1, %v631_v12 }
 0x1c5   : > { %1285 = vmatmul.msk.f32.gmra.mxu3 %vm385_vm1, %v632_v14 }
 0x1cd   : > { %1286 = vmatmul.msk.f32.gmra.mxu3 %vm385_vm1, %v633_v16 }
 0x1d8   : > { %v748_v19 = vpop.f32.mrf.mxu3 }
 0x1e0   : > { %v751_v20 = vpop.f32.mrf.mxu3 }
 0x1e8   : > { %v754_v21 = vpop.f32.mrf.mxu3 }
 0x1f0   : > { %v757_v22 = vpop.f32.mrf.mxu3 }
 0x1f8   : > { %v760_v23 = vpop.f32.mrf.mxu3 }
 0x1f9   : > { %v796_v35 = vmax.f32 %v748_v19, %v760_v23 }
 0x200   : > { %v763_v24 = vpop.f32.mrf.mxu3 }
 0x201   : > { %v797_v34 = vmax.f32 %v751_v20, %v763_v24 }
 0x208   : > { %v766_v25 = vpop.f32.mrf.mxu3 }
 0x209   : > { %v798_v36 = vmax.f32 %v754_v21, %v766_v25 }
 0x210   : > { %v769_v26 = vpop.f32.mrf.mxu3 }
 0x211   : > { %v799_v37 = vmax.f32 %v757_v22, %v769_v26 }
 0x218   : > { %v772_v27 = vpop.f32.mrf.mxu3 }
 0x219   : > { %v800_v39 = vmax.f32 %v796_v35, %v772_v27 }
 0x220   : > { %v1614_v28 = vpop.f32.mrf.mxu3 }
 0x221   : > { %v801_v38 = vmax.f32 %v797_v34, %v1614_v28 }
 0x228   : > { %v1616_v29 = vpop.f32.mrf.mxu3 }
 0x229   : > { %v802_v40 = vmax.f32 %v798_v36, %v1616_v29 }
 0x230   : > { %v1618_v30 = vpop.f32.mrf.mxu3 }
 0x231   : > { %v803_v41 = vmax.f32 %v799_v37, %v1618_v30 }
 0x238   : > { %v1620_v31 = vpop.f32.mrf.mxu3 }
 0x239   : > { %v804_v44 = vmax.f32 %v800_v39, %v1620_v31 }
 0x240   : > { %v1622_v32 = vpop.f32.mrf.mxu3 }
 0x241   : > { %v805_v42 = vmax.f32 %v801_v38, %v1622_v32 }
 0x243   : > { %v808_v47 = vmax.f32 %v804_v44, %v805_v42 }
 0x248   : > { %v1624_v33 = vpop.f32.mrf.mxu3 }
 0x249   : > { %v806_v45 = vmax.f32 %v802_v40, %v1624_v33 }
 0x250   : > { %v1630_v43 = vpop.f32.mrf.mxu3 }
 0x251   : > { %v807_v46 = vmax.f32 %v803_v41, %v1630_v43 }
 0x253   : > { %v809_v48 = vmax.f32 %v806_v45, %v807_v46 }
 0x255   : > { %v810_v49 = vmax.f32 %v808_v47, %v809_v48 }
 0x257   : > { %v811_v50 = vrot.slane %v810_v49, 4 }
 0x259   : > { %v812_v51 = vmax.f32 %v810_v49, %v811_v50 }
 0x25b   : > { %v813_v52 = vrot.slane %v812_v51, 2 }
 0x25d   : > { %v814_v53 = vmax.f32 %v812_v51, %v813_v52 }
 0x25f   : > { %v815_v54 = vrot.slane %v814_v53, 1 }
 0x261   : > { %v1635_v55 = vmax.f32 %v814_v53, %v815_v54 }
 0x263   : > { %v817_v56 = vsub.f32 %v748_v19, %v1635_v55  ;;  %v818_v57 = vsub.f32 %v751_v20, %v1635_v55  ;;  %v819_v58 = vsub.f32 %v754_v21, %v1635_v55  ;;  %v820_v59 = vsub.f32 %v757_v22, %v1635_v55 }
 0x264   : > { %v821_v62 = vsub.f32 %v760_v23, %v1635_v55  ;;  %v822_v0 = vsub.f32 %v763_v24, %v1635_v55  ;;  %v823_v2 = vsub.f32 %v766_v25, %v1635_v55  ;;  %v824_v4 = vsub.f32 %v769_v26, %v1635_v55 }
 0x265   : > { %v833_v60 = vmul.f32 1.442695, %v817_v56  ;;  %v835_v61 = vmul.f32 1.442695, %v818_v57  ;;  %v837_v63 = vmul.f32 1.442695, %v819_v58  ;;  %v825_v8 = vsub.f32 %v772_v27, %v1635_v55 }
 0x266   : > { %v839_v1 = vmul.f32 1.442695, %v820_v59  ;;  %v841_v3 = vmul.f32 1.442695, %v821_v62  ;;  %v843_v5 = vmul.f32 1.442695, %v822_v0  ;;  %v826_v12 = vsub.f32 %v1614_v28, %v1635_v55 }
 0x267   : > { %1334 = vpow2.f32 %v833_v60  ;;  %v845_v9 = vmul.f32 1.442695, %v823_v2  ;;  %v847_v13 = vmul.f32 1.442695, %v824_v4  ;;  %v827_v16 = vsub.f32 %v1616_v29, %v1635_v55 }
 0x268   : > { %1336 = vpow2.f32 %v835_v61  ;;  %v849_v17 = vmul.f32 1.442695, %v825_v8  ;;  %v828_v20 = vsub.f32 %v1618_v30, %v1635_v55  ;;  %v851_v21 = vmul.f32 1.442695, %v826_v12 }
 0x269   : > { %1338 = vpow2.f32 %v837_v63  ;;  %v829_v24 = vsub.f32 %v1620_v31, %v1635_v55  ;;  %v853_v25 = vmul.f32 1.442695, %v827_v16  ;;  %v830_v28 = vsub.f32 %v1622_v32, %v1635_v55 }
 0x26a   : > { %1340 = vpow2.f32 %v839_v1  ;;  %v855_v29 = vmul.f32 1.442695, %v828_v20  ;;  %v831_v35 = vsub.f32 %v1624_v33, %v1635_v55  ;;  %v832_v31 = vsub.f32 %v1630_v43, %v1635_v55 }
 0x26b   : > { %1342 = vpow2.f32 %v841_v3  ;;  %v857_v36 = vmul.f32 1.442695, %v829_v24  ;;  %v859_v39 = vmul.f32 1.442695, %v830_v28 }
 0x26c   : > { %1344 = vpow2.f32 %v843_v5  ;;  %v861_v32 = vmul.f32 1.442695, %v831_v35  ;;  %v863_v45 = vmul.f32 1.442695, %v832_v31 }
 0x26d   : > { %v1645_v6 = vpop.eup %1334  ;;  %1346 = vpow2.f32 %v845_v9 }
 0x26e   : > { %v1647_v7 = vpop.eup %1336  ;;  %1348 = vpow2.f32 %v847_v13 }
 0x26f   : > { %v865_v10 = vadd.f32 %v1647_v7, %v1645_v6  ;;  %v1652_v11 = vpop.eup %1338  ;;  %1350 = vpow2.f32 %v849_v17 }
 0x270   : > { %v1657_v15 = vpop.eup %1340  ;;  %1352 = vpow2.f32 %v851_v21 }
 0x271   : > { %v866_v14 = vadd.f32 %v1652_v11, %v865_v10  ;;  %v1662_v19 = vpop.eup %1342  ;;  %1354 = vpow2.f32 %v853_v25 }
 0x272   : > { %v1667_v23 = vpop.eup %1344  ;;  %1356 = vpow2.f32 %v855_v29 }
 0x273   : > { %v867_v18 = vadd.f32 %v1657_v15, %v866_v14  ;;  %v1347_v27 = vpop.eup %1346  ;;  %1358 = vpow2.f32 %v857_v36 }
 0x274   : > { %v1349_v34 = vpop.eup %1348  ;;  %1360 = vpow2.f32 %v859_v39 }
 0x275   : > { %v868_v22 = vadd.f32 %v1662_v19, %v867_v18  ;;  %v1351_v38 = vpop.eup %1350  ;;  %1362 = vpow2.f32 %v861_v32 }
 0x276   : > { %v1353_v41 = vpop.eup %1352  ;;  %1364 = vpow2.f32 %v863_v45 }
 0x277   : > { %v869_v26 = vadd.f32 %v1667_v23, %v868_v22  ;;  %v1355_v44 = vpop.eup %1354 }
 0x278   : > { %v1357_v47 = vpop.eup %1356 }
 0x279   : > { %v870_v30 = vadd.f32 %v1347_v27, %v869_v26  ;;  %v1359_v48 = vpop.eup %1358 }
 0x27a   : > { %v1361_v50 = vpop.eup %1360 }
 0x27b   : > { %v871_v37 = vadd.f32 %v1349_v34, %v870_v30  ;;  %v1363_v43 = vpop.eup %1362 }
 0x27c   : > { %v1365_v53 = vpop.eup %1364 }
 0x27d   : > { %v872_v40 = vadd.f32 %v1351_v38, %v871_v37 }
 0x27f   : > { %v873_v42 = vadd.f32 %v1353_v41, %v872_v40 }
 0x281   : > { %v874_v46 = vadd.f32 %v1355_v44, %v873_v42 }
 0x283   : > { %v875_v33 = vadd.f32 %v1357_v47, %v874_v46 }
 0x285   : > { %v876_v49 = vadd.f32 %v1359_v48, %v875_v33 }
 0x287   : > { %v877_v51 = vadd.f32 %v1361_v50, %v876_v49 }
 0x289   : > { %v878_v52 = vadd.f32 %v1363_v43, %v877_v51 }
 0x28b   : > { %v879_v54 = vadd.f32 %v1365_v53, %v878_v52 }
 0x28d   : > { %v880_v55 = vrot.slane %v879_v54, 4 }
 0x28f   : > { %v881_v56 = vadd.f32 %v880_v55, %v879_v54 }
 0x291   : > { %v882_v57 = vrot.slane %v881_v56, 2 }
 0x293   : > { %v883_v58 = vadd.f32 %v882_v57, %v881_v56 }
 0x295   : > { %v884_v59 = vrot.slane %v883_v58, 1 }
 0x297   : > { %v885_v60 = vadd.f32 %v884_v59, %v883_v58 }
 0x299   : > { %1366 = vrcp.f32 %v885_v60  ;;  %v897_v0 = vand.u32 2147483648, %v885_v60  ;;  %v895_v2 = vand.u32 2147483647, %v885_v60  ;;  %vm891_vm3 = vweird.f32 %v885_v60 }
 0x29b   : > { %v898_v4 = vor.u32 1.1754944e-38, %v897_v0  ;;  %vm896_vm5 = vcmp.eq.f32.partialorder %v895_v2, 8.507059e+37 }
 0x29f   : > { %v1367_v61 = vpop.eup %1366 }
 0x2a0   : > { %v887_v62 = vmul.f32 %v1367_v61, %v885_v60  ;;  %vm892_vm2 = vweird.f32 %v1367_v61 }
 0x2a1   : > { %vm893_vm4 = vmor %vm891_vm3, %vm892_vm2 }
 0x2a2   : > { %v888_v63 = vsub.f32 1.0, %v887_v62 }
 0x2a4   : > { %v889_v1 = vmul.f32 %v1367_v61, %v888_v63 }
 0x2a6   : > { %v890_v3 = vadd.f32 %v1367_v61, %v889_v1 }
 0x2a8   : > { %v894_v5 = vsel %vm893_vm4, %v1367_v61, %v890_v3 }
 0x2a9   : > { %v899_v8 = vsel %vm896_vm5, %v898_v4, %v894_v5 }
 0x2aa   : > { %v901_v9 = vmul.f32 %v1645_v6, %v899_v8  ;;  %v902_v10 = vmul.f32 %v1647_v7, %v899_v8  ;;  %v903_v12 = vmul.f32 %v1652_v11, %v899_v8  ;;  %v904_v13 = vmul.f32 %v1657_v15, %v899_v8 }
 0x2ab   : > { %v905_v14 = vmul.f32 %v1662_v19, %v899_v8  ;;  %v906_v16 = vmul.f32 %v1667_v23, %v899_v8  ;;  %v907_v17 = vmul.f32 %v1347_v27, %v899_v8  ;;  %v908_v18 = vmul.f32 %v1349_v34, %v899_v8 }
 0x2ac   : > { %949 = vmatmul.f32.vlgmr.msrb.gmra.mxu0 %v901_v9  ;;  %v909_v20 = vmul.f32 %v1351_v38, %v899_v8  ;;  %v910_v21 = vmul.f32 %v1353_v41, %v899_v8  ;;  %v911_v22 = vmul.f32 %v1355_v44, %v899_v8  ;;  %v912_v24 = vmul.f32 %v1357_v47, %v899_v8 }
 0x2ad   : > { %v913_v25 = vmul.f32 %v1359_v48, %v899_v8  ;;  %v914_v26 = vmul.f32 %v1361_v50, %v899_v8  ;;  %v915_v6 = vmul.f32 %v1363_v43, %v899_v8  ;;  %v916_v28 = vmul.f32 %v1365_v53, %v899_v8 }
 0x2ae   : > { %v1392_v7 = vmov 0.0  }
 0x2af   : > { %402 = vst.msk [vmem:[#allocation3] sm:$0xff] %vm385_vm1, %v1392_v7 }
 0x2b0   : > { %403 = vst.msk [vmem:[#allocation3 + $0x8] sm:$0xff] %vm385_vm1, %v1392_v7 }
 0x2b1   : > { %404 = vst.msk [vmem:[#allocation3 + $0x10] sm:$0xff] %vm385_vm1, %v1392_v7 }
 0x2b2   : > { %405 = vst.msk [vmem:[#allocation3 + $0x18] sm:$0xff] %vm385_vm1, %v1392_v7 }
 0x2b3   : > { %406 = vst.msk [vmem:[#allocation3 + $0x20] sm:$0xff] %vm385_vm1, %v1392_v7 }
 0x2b4   : > { %952 = vmatmul.f32.gmra.mxu0 %v902_v10  ;;  %407 = vst.msk [vmem:[#allocation3 + $0x28] sm:$0xff] %vm385_vm1, %v1392_v7 }
 0x2b5   : > { %408 = vst.msk [vmem:[#allocation3 + $0x30] sm:$0xff] %vm385_vm1, %v1392_v7 }
 0x2b6   : > { %409 = vst.msk [vmem:[#allocation3 + $0x38] sm:$0xff] %vm385_vm1, %v1392_v7  ;;  %v917_v11 = vld [vmem:[#allocation3] sm:$0xff] }
 0x2b7   : > { %410 = vst.msk [vmem:[#allocation3 + $0x40] sm:$0xff] %vm385_vm1, %v1392_v7  ;;  %v918_v23 = vld [vmem:[#allocation3 + $0x8] sm:$0xff] }
 0x2b8   : > { %411 = vst.msk [vmem:[#allocation3 + $0x48] sm:$0xff] %vm385_vm1, %v1392_v7  ;;  %v919_v30 = vld [vmem:[#allocation3 + $0x10] sm:$0xff] }
 0x2b9   : > { %412 = vst.msk [vmem:[#allocation3 + $0x50] sm:$0xff] %vm385_vm1, %v1392_v7  ;;  %v920_v36 = vld [vmem:[#allocation3 + $0x18] sm:$0xff] }
 0x2ba   : > { %413 = vst.msk [vmem:[#allocation3 + $0x58] sm:$0xff] %vm385_vm1, %v1392_v7  ;;  %v921_v31 = vld [vmem:[#allocation3 + $0x20] sm:$0xff] }
 0x2bb   : > { %414 = vst.msk [vmem:[#allocation3 + $0x60] sm:$0xff] %vm385_vm1, %v1392_v7  ;;  %v922_v41 = vld [vmem:[#allocation3 + $0x28] sm:$0xff] }
 0x2bc   : > { %955 = vmatmul.f32.gmra.mxu0 %v903_v12  ;;  %415 = vst.msk [vmem:[#allocation3 + $0x68] sm:$0xff] %vm385_vm1, %v1392_v7  ;;  %v923_v44 = vld [vmem:[#allocation3 + $0x30] sm:$0xff] }
 0x2bd   : > { %416 = vst.msk [vmem:[#allocation3 + $0x70] sm:$0xff] %vm385_vm1, %v1392_v7  ;;  %v924_v47 = vld [vmem:[#allocation3 + $0x38] sm:$0xff] }
 0x2be   : > { %417 = vst.msk [vmem:[#allocation3 + $0x78] sm:$0xff] %vm385_vm1, %v1392_v7  ;;  %v925_v49 = vld [vmem:[#allocation3 + $0x40] sm:$0xff] }
 0x2bf   : > { %v926_v43 = vld [vmem:[#allocation3 + $0x48] sm:$0xff] }
 0x2c0   : > { %v927_v54 = vld [vmem:[#allocation3 + $0x50] sm:$0xff] }
 0x2c1   : > { %v928_v57 = vld [vmem:[#allocation3 + $0x58] sm:$0xff] }
 0x2c2   : > { %v929_v60 = vld [vmem:[#allocation3 + $0x60] sm:$0xff] }
 0x2c3   : > { %v930_v63 = vld [vmem:[#allocation3 + $0x68] sm:$0xff] }
 0x2c4   : > { %958 = vmatmul.f32.gmra.mxu0 %v904_v13  ;;  %v931_v2 = vld [vmem:[#allocation3 + $0x70] sm:$0xff] }
 0x2c5   : > { %v932_v5 = vld [vmem:[#allocation3 + $0x78] sm:$0xff] }
 0x2cc   : > { %961 = vmatmul.f32.gmra.mxu0 %v905_v14 }
 0x2d4   : > { %964 = vmatmul.f32.gmra.mxu0 %v906_v16 }
 0x2dc   : > { %967 = vmatmul.f32.gmra.mxu0 %v907_v17 }
 0x2e4   : > { %970 = vmatmul.f32.gmra.mxu0 %v908_v18 }
 0x2ec   : > { %973 = vmatmul.f32.gmra.mxu0 %v909_v20 }
 0x2f4   : > { %976 = vmatmul.f32.gmra.mxu0 %v910_v21 }
 0x2fc   : > { %979 = vmatmul.f32.gmra.mxu0 %v911_v22 }
 0x304   : > { %982 = vmatmul.f32.gmra.mxu0 %v912_v24 }
 0x30c   : > { %985 = vmatmul.f32.gmra.mxu0 %v913_v25 }
 0x314   : > { %988 = vmatmul.f32.gmra.mxu0 %v914_v26 }
 0x31c   : > { %991 = vmatmul.f32.gmra.mxu0 %v915_v6 }
 0x324   : > { %994 = vmatmul.f32.gmra.mxu0 %v916_v28 }
 0x329   : > { %v950_v15 = vpop.f32.mrf.mxu0 }
 0x32a   : > { %v998_v19 = vadd.f32 %v950_v15, %v917_v11  ;;  %v1033_v11 = vld [vmem:[%s1753_s4] sm:$0xff] }
 0x32c   : > { %1014 = vst.msk [vmem:[#allocation3] sm:$0xff] %vm385_vm1, %v998_v19 }
 0x331   : > { %v953_v27 = vpop.f32.mrf.mxu0 }
 0x332   : > { %v999_v29 = vadd.f32 %v953_v27, %v918_v23 }
 0x333   : > { %v1034_v7 = vld [vmem:[#allocation3] sm:$0xff] }
 0x334   : > { %1015 = vst.msk [vmem:[#allocation3 + $0x8] sm:$0xff] %vm385_vm1, %v999_v29 }
 0x339   : > { %v956_v34 = vpop.f32.mrf.mxu0 }
 0x33a   : > { %v1000_v35 = vadd.f32 %v956_v34, %v919_v30 }
 0x33b   : > { %v1035_v28 = vld [vmem:[#allocation3 + $0x8] sm:$0xff] }
 0x33c   : > { %1016 = vst.msk [vmem:[#allocation3 + $0x10] sm:$0xff] %vm385_vm1, %v1000_v35 }
 0x341   : > { %v959_v37 = vpop.f32.mrf.mxu0 }
 0x342   : > { %v1001_v38 = vadd.f32 %v959_v37, %v920_v36 }
 0x343   : > { %v1036_v6 = vld [vmem:[#allocation3 + $0x10] sm:$0xff] }
 0x344   : > { %1017 = vst.msk [vmem:[#allocation3 + $0x18] sm:$0xff] %vm385_vm1, %v1001_v38 }
 0x349   : > { %v962_v39 = vpop.f32.mrf.mxu0 }
 0x34a   : > { %v1002_v40 = vadd.f32 %v962_v39, %v921_v31 }
 0x34b   : > { %v1037_v26 = vld [vmem:[#allocation3 + $0x18] sm:$0xff] }
 0x34c   : > { %1018 = vst.msk [vmem:[#allocation3 + $0x20] sm:$0xff] %vm385_vm1, %v1002_v40 }
 0x351   : > { %v965_v32 = vpop.f32.mrf.mxu0 }
 0x352   : > { %v1003_v42 = vadd.f32 %v965_v32, %v922_v41 }
 0x353   : > { %v1038_v25 = vld [vmem:[#allocation3 + $0x20] sm:$0xff] }
 0x354   : > { %1019 = vst.msk [vmem:[#allocation3 + $0x28] sm:$0xff] %vm385_vm1, %v1003_v42 }
 0x359   : > { %v968_v45 = vpop.f32.mrf.mxu0 }
 0x35a   : > { %v1004_v46 = vadd.f32 %v968_v45, %v923_v44 }
 0x35b   : > { %v1039_v24 = vld [vmem:[#allocation3 + $0x28] sm:$0xff] }
 0x35c   : > { %1020 = vst.msk [vmem:[#allocation3 + $0x30] sm:$0xff] %vm385_vm1, %v1004_v46 }
 0x361   : > { %v971_v33 = vpop.f32.mrf.mxu0 }
 0x362   : > { %v1005_v48 = vadd.f32 %v971_v33, %v924_v47 }
 0x363   : > { %v1040_v22 = vld [vmem:[#allocation3 + $0x30] sm:$0xff] }
 0x364   : > { %1021 = vst.msk [vmem:[#allocation3 + $0x38] sm:$0xff] %vm385_vm1, %v1005_v48 }
 0x369   : > { %v974_v50 = vpop.f32.mrf.mxu0 }
 0x36a   : > { %v1006_v51 = vadd.f32 %v974_v50, %v925_v49 }
 0x36b   : > { %v1041_v21 = vld [vmem:[#allocation3 + $0x38] sm:$0xff] }
 0x36c   : > { %1022 = vst.msk [vmem:[#allocation3 + $0x40] sm:$0xff] %vm385_vm1, %v1006_v51 }
 0x371   : > { %v977_v52 = vpop.f32.mrf.mxu0 }
 0x372   : > { %v1007_v53 = vadd.f32 %v977_v52, %v926_v43 }
 0x373   : > { %v1042_v20 = vld [vmem:[#allocation3 + $0x40] sm:$0xff] }
 0x374   : > { %1023 = vst.msk [vmem:[#allocation3 + $0x48] sm:$0xff] %vm385_vm1, %v1007_v53 }
 0x379   : > { %v980_v55 = vpop.f32.mrf.mxu0 }
 0x37a   : > { %v1008_v56 = vadd.f32 %v980_v55, %v927_v54 }
 0x37b   : > { %v1043_v18 = vld [vmem:[#allocation3 + $0x48] sm:$0xff] }
 0x37c   : > { %1024 = vst.msk [vmem:[#allocation3 + $0x50] sm:$0xff] %vm385_vm1, %v1008_v56 }
 0x381   : > { %v983_v58 = vpop.f32.mrf.mxu0 }
 0x382   : > { %v1009_v59 = vadd.f32 %v983_v58, %v928_v57 }
 0x383   : > { %v1044_v17 = vld [vmem:[#allocation3 + $0x50] sm:$0xff] }
 0x384   : > { %1025 = vst.msk [vmem:[#allocation3 + $0x58] sm:$0xff] %vm385_vm1, %v1009_v59 }
 0x389   : > { %v986_v61 = vpop.f32.mrf.mxu0 }
 0x38a   : > { %v1010_v62 = vadd.f32 %v986_v61, %v929_v60 }
 0x38b   : > { %v1045_v16 = vld [vmem:[#allocation3 + $0x58] sm:$0xff] }
 0x38c   : > { %1026 = vst.msk [vmem:[#allocation3 + $0x60] sm:$0xff] %vm385_vm1, %v1010_v62 }
 0x391   : > { %v989_v0 = vpop.f32.mrf.mxu0 }
 0x392   : > { %v1011_v1 = vadd.f32 %v989_v0, %v930_v63 }
 0x393   : > { %v1046_v14 = vld [vmem:[#allocation3 + $0x60] sm:$0xff] }
 0x394   : > { %1027 = vst.msk [vmem:[#allocation3 + $0x68] sm:$0xff] %vm385_vm1, %v1011_v1 }
 0x399   : > { %v992_v3 = vpop.f32.mrf.mxu0 }
 0x39a   : > { %v1012_v4 = vadd.f32 %v992_v3, %v931_v2 }
 0x39b   : > { %v1047_v13 = vld [vmem:[#allocation3 + $0x68] sm:$0xff] }
 0x39c   : > { %1028 = vst.msk [vmem:[#allocation3 + $0x70] sm:$0xff] %vm385_vm1, %v1012_v4 }
 0x3a1   : > { %v995_v8 = vpop.f32.mrf.mxu0 }
 0x3a2   : > { %v1013_v9 = vadd.f32 %v995_v8, %v932_v5 }
 0x3a3   : > { %v1048_v12 = vld [vmem:[#allocation3 + $0x70] sm:$0xff] }
 0x3a4   : > { %1029 = vst.msk [vmem:[#allocation3 + $0x78] sm:$0xff] %vm385_vm1, %v1013_v9 }
 0x3ab   : > { %v1049_v10 = vld [vmem:[#allocation3 + $0x78] sm:$0xff] }
 0x3ac   : > { %1287 = vmatpush.xpose.msk.msra.mxu1 %vm385_vm1, %v1049_v10 }
 0x3b0   : > { %1288 = vmatpush.xpose.msk.msra.mxu1 %vm385_vm1, %v1048_v12 }
 0x3b4   : > { %1289 = vmatpush.xpose.msk.msra.mxu1 %vm385_vm1, %v1047_v13 }
 0x3b8   : > { %1290 = vmatpush.xpose.msk.msra.mxu1 %vm385_vm1, %v1046_v14 }
 0x3bc   : > { %1291 = vmatpush.xpose.msk.msra.mxu1 %vm385_vm1, %v1045_v16 }
 0x3c0   : > { %1292 = vmatpush.xpose.msk.msra.mxu1 %vm385_vm1, %v1044_v17 }
 0x3c4   : > { %1293 = vmatpush.xpose.msk.msra.mxu1 %vm385_vm1, %v1043_v18 }
 0x3c8   : > { %1294 = vmatpush.xpose.msk.msra.mxu1 %vm385_vm1, %v1042_v20 }
 0x3cc   : > { %1295 = vmatpush.xpose.msk.msra.mxu1 %vm385_vm1, %v1041_v21 }
 0x3d0   : > { %1296 = vmatpush.xpose.msk.msra.mxu1 %vm385_vm1, %v1040_v22 }
 0x3d4   : > { %1297 = vmatpush.xpose.msk.msra.mxu1 %vm385_vm1, %v1039_v24 }
 0x3d8   : > { %1298 = vmatpush.xpose.msk.msra.mxu1 %vm385_vm1, %v1038_v25 }
 0x3dc   : > { %1299 = vmatpush.xpose.msk.msra.mxu1 %vm385_vm1, %v1037_v26 }
 0x3e0   : > { %1300 = vmatpush.xpose.msk.msra.mxu1 %vm385_vm1, %v1036_v6 }
 0x3e4   : > { %1301 = vmatpush.xpose.msk.msra.mxu1 %vm385_vm1, %v1035_v28 }
 0x3e8   : > { %1302 = vmatpush.xpose.msk.msra.mxu1 %vm385_vm1, %v1034_v7 }
 0x3eb   : > { %1303 = vmatmul.msk.f32.vlgmr.msra.gmra.mxu1 %vm385_vm1, %v1033_v11 }
 0x468   : > { %v1118_v15 = vpop.f32.mrf.mxu1 }
 0x469   : > { %1121 = vst [vmem:[%s249_s12] sm:$0xff] %v1118_v15 }
 0x46a PF: > { %s15_s20 = sadd.s32 1, %s1390_s20   ;;  %s1755_s18 = smov %s1386_s19 }
 0x46b   : > { %p12_p5 = scmp.ge.s32.totalorder %s15_s20, 4   ;;  %s1756_s19 = smov %s1758_s21 }
 0x46d   :  { %14 = sbr.rel (!%p12_p5) target bundleno = 2 (0x2), region = 79 }

</bundles_post_ra>
